<compile_context>
chip_gen: v7x
topology: tpu7x:2x2x1
jax: 0.10.0
libtpu: 0.0.40
codegen_flags: <defaults>
</compile_context>

<pallas_src>
import jax
import jax.numpy as jnp
from jax import lax
from jax.experimental import pallas as pl
from jax.experimental.pallas import tpu as pltpu


def _round_up(x, m):
    return (x + m - 1) // m * m


# --------------------------- in-kernel math helper ----------------------------


def _posterior_sample(mu_q_hat, logvar_q_hat, mu_p, logvar_p, eps):
    """Precision-weighted posterior + reparameterization (EUP-reduced form).

    Mathematically identical to the torch module:
      precision = exp(lq)^-2 + exp(lp)^-2           == exp(-2*lq) + exp(-2*lp)
      logvar_q  = log(1/precision)                  == -log(precision)
      std       = exp(0.5*logvar_q)                 == rsqrt(precision)
    """
    precision = jnp.exp(-2.0 * logvar_q_hat) + jnp.exp(-2.0 * logvar_p)
    logvar_q = -jnp.log(precision)
    mu_q = logvar_q * (mu_q_hat * jnp.sqrt(logvar_q_hat)
                       + mu_p * jnp.sqrt(logvar_p))
    return mu_q + eps * lax.rsqrt(precision)


# ------------------------------ Pallas kernel ----------------------------------


def _make_inference_kernel(layer_specs, num_hidden, matmul_dtype):
    """Fused kernel over all LatentLayers (processing order: top layer first)."""
    n_layers = len(layer_specs)

    def kernel(*refs):
        slab_ref = refs[0]
        data_refs = refs[1:1 + 4 * n_layers]
        out_refs = refs[1 + 4 * n_layers:]

        def piece(off, rows, cols):
            # Static slice of the packed weight slab (zero-cost view -> load).
            return slab_ref[pl.ds(off, rows), pl.ds(0, cols)]

        z_prev = None
        for s, sp in enumerate(layer_specs):
            d_ref, mu_p_ref, lv_p_ref, eps_ref = data_refs[4 * s: 4 * s + 4]
            H = sp["hidden"]
            Cd = sp["tcn_dim"]
            Cz = sp["lat_in"]
            Co = sp["lat_out"]

            # enc_in: 1x1 conv == (H, Cin) @ (Cin, TL); cat((d, z), dim=1) is
            # folded into two matmuls so z never leaves VMEM/registers.
            acc = jnp.dot(piece(sp["w_in_d"], H, Cd).astype(matmul_dtype),
                          d_ref[...].astype(matmul_dtype),
                          preferred_element_type=jnp.float32)
            if Cz > 0:
                acc = acc + jnp.dot(
                    piece(sp["w_in_z"], H, Cz).astype(matmul_dtype),
                    z_prev.astype(matmul_dtype),
                    preferred_element_type=jnp.float32)
            h = jnp.tanh(acc + piece(sp["b_in"], H, 1))

            # enc_hidden: num_hidden x (tanh o 1x1 conv)
            for j in range(num_hidden):
                h = jnp.tanh(
                    jnp.dot(piece(sp["w_hid"][j], H, H).astype(matmul_dtype),
                            h.astype(matmul_dtype),
                            preferred_element_type=jnp.float32)
                    + piece(sp["b_hid"][j], H, 1))

            # stacked heads: one matmul produces [mu_q_hat ; logvar_q_hat]
            heads = jnp.dot(piece(sp["w_o"], 2 * Co, H).astype(matmul_dtype),
                            h.astype(matmul_dtype),
                            preferred_element_type=jnp.float32) \
                + piece(sp["b_o"], 2 * Co, 1)
            mu_q_hat = heads[:Co]
            lv_q_hat = heads[Co:]

            z = _posterior_sample(mu_q_hat, lv_q_hat,
                                  mu_p_ref[...], lv_p_ref[...], eps_ref[...])
            out_refs[s][...] = z.astype(out_refs[s].dtype)
            z_prev = z

    return kernel


# --------------------------------- wrapper --------------------------------------


def inference_forward(params, d_list, mu_p_list, logvar_p_list, eps_list,
                      num_hidden, matmul_dtype=jnp.float32):
    """InferenceModel.forward.  All inputs in PyTorch NCL layout.

    Returns the list z (top layer first), matching the torch module.
    `matmul_dtype=jnp.bfloat16` is recommended on v6e/v7x at real scale
    (accumulation stays f32); kept f32 for this correctness demo.
    """
    nl = len(params)
    order = [nl - 1] + list(reversed(range(nl - 1)))   # processing order

    N, _, L = d_list[0].shape
    NL = N * L
    # Fold batch into the lane axis; lane tile up to 1024, padded to mult of 128.
    TL = min(_round_up(NL, 128), 1024)
    NLp = _round_up(NL, TL)
    grid = (NLp // TL,)

    def to_cl(x):   # (N, C, L) -> (C, NLp), lane-dense
        c = x.shape[1]
        y = jnp.transpose(x, (1, 0, 2)).reshape(c, NL)
        if NLp != NL:
            y = jnp.pad(y, ((0, 0), (0, NLp - NL)))
        return y

    # ---- pack all weights & biases into one contiguous slab (single DMA) ----
    pieces = []           # (row_offset, 2-D array)
    row_cursor = [0]

    def alloc(a2d):
        off = row_cursor[0]
        pieces.append((off, a2d))
        row_cursor[0] = off + _round_up(a2d.shape[0], 8)   # 8-aligned offsets
        return off

    layer_specs = []
    for s, idx in enumerate(order):
        p = params[idx]
        tcn_dim = p["tcn_dim"]
        lat_in = p["lat_in"]
        H = p["w_in"].shape[0]
        Co = p["w_o1"].shape[0]
        sp = {"tcn_dim": tcn_dim, "lat_in": lat_in, "hidden": H, "lat_out": Co}
        sp["w_in_d"] = alloc(p["w_in"][:, :tcn_dim])
        if lat_in > 0:
            sp["w_in_z"] = alloc(p["w_in"][:, tcn_dim:])
        sp["b_in"] = alloc(p["b_in"].reshape(H, 1))
        sp["w_hid"], sp["b_hid"] = [], []
        for j in range(num_hidden):
            sp["w_hid"].append(alloc(p["w_hid"][j]))
            sp["b_hid"].append(alloc(p["b_hid"][j].reshape(H, 1)))
        # stacked output heads
        sp["w_o"] = alloc(jnp.concatenate([p["w_o1"], p["w_o2"]], axis=0))
        sp["b_o"] = alloc(
            jnp.concatenate([p["b_o1"], p["b_o2"]]).reshape(2 * Co, 1))
        layer_specs.append(sp)

    slab_rows = _round_up(row_cursor[0], 8)
    slab_cols = max(a.shape[1] for _, a in pieces)
    slab = jnp.zeros((slab_rows, slab_cols), jnp.float32)
    for off, a in pieces:
        slab = slab.at[off:off + a.shape[0], :a.shape[1]].set(
            a.astype(jnp.float32))

    # ---- args / specs ----
    args = [slab]
    # Grid-invariant slab (index_map constant) -> fetched once, one DMA.
    in_specs = [pl.BlockSpec((slab_rows, slab_cols), lambda t: (0, 0))]
    for s, idx in enumerate(order):
        for arr in (d_list[idx], mu_p_list[idx], logvar_p_list[idx],
                    eps_list[s]):
            a2 = to_cl(arr)
            args.append(a2)
            in_specs.append(pl.BlockSpec((a2.shape[0], TL), lambda t: (0, t)))

    out_shapes = tuple(
        jax.ShapeDtypeStruct((params[idx]["w_o1"].shape[0], NLp), jnp.float32)
        for idx in order)
    out_specs = tuple(
        pl.BlockSpec((params[idx]["w_o1"].shape[0], TL), lambda t: (0, t))
        for idx in order)

    # ---- explicit VMEM accounting (matters on v7x's 64 MiB) ----
    def blk_bytes(rows, cols):
        return _round_up(rows, 8) * _round_up(cols, 128) * 4
    est = blk_bytes(slab_rows, slab_cols) * 2
    est += sum(blk_bytes(a.shape[0], TL) for a in args[1:]) * 2
    est += sum(blk_bytes(o.shape[0], TL) for o in out_shapes) * 2
    vmem_limit = int(min(64 * 2**20, max(16 * 2**20, 4 * est)))

    kernel = _make_inference_kernel(layer_specs, num_hidden, matmul_dtype)

    z_flat = pl.pallas_call(
        kernel,
        grid=grid,
        in_specs=in_specs,
        out_specs=out_specs,
        out_shape=out_shapes,
        compiler_params=pltpu.CompilerParams(
            dimension_semantics=(("parallel",) if grid[0] > 1
                                 else ("arbitrary",)),
            vmem_limit_bytes=vmem_limit),
    )(*args)

    # (C, NLp) -> (N, C, L)
    out = []
    for z2 in z_flat:
        c = z2.shape[0]
        out.append(jnp.transpose(z2[:, :NL].reshape(c, N, L), (1, 0, 2)))
    return out


# ------------------------------ params / glue -----------------------------------


def init_params(key, tcn_channels, latent_channels, num_hidden):
    """Deterministic synthetic parameters matching InferenceModel's layer shapes."""
    nl = len(tcn_channels)
    params = []
    for i in range(nl):
        tcn_dim = tcn_channels[i]
        lat_in = latent_channels[i + 1] if i < nl - 1 else 0
        lat_out = latent_channels[i]
        hidden = latent_channels[i]
        cin = tcn_dim + lat_in

        key, *ks = jax.random.split(key, 9)
        p = {
            "tcn_dim": tcn_dim,
            "lat_in": lat_in,
            "w_in": 0.05 * jax.random.normal(ks[0], (hidden, cin), jnp.float32),
            "b_in": 0.05 * jax.random.normal(ks[1], (hidden,), jnp.float32),
            "w_o1": 0.05 * jax.random.normal(ks[4], (lat_out, hidden), jnp.float32),
            "b_o1": 0.05 * jax.random.normal(ks[5], (lat_out,), jnp.float32),
            "w_o2": 0.05 * jax.random.normal(ks[6], (lat_out, hidden), jnp.float32),
            # +0.5 bias keeps logvar_q_hat > 0 so sqrt(logvar_q_hat) (as written
            # in the torch module) stays real for the test.
            "b_o2": 0.5 + 0.05 * jax.random.normal(ks[7], (lat_out,), jnp.float32),
        }
        if num_hidden > 0:
            p["w_hid"] = 0.05 * jax.random.normal(
                ks[2], (num_hidden, hidden, hidden), jnp.float32)
            p["b_hid"] = 0.05 * jax.random.normal(
                ks[3], (num_hidden, hidden), jnp.float32)
        else:
            p["w_hid"] = None
            p["b_hid"] = None
        params.append(p)
    return params


# ----------------------------- pure-JAX reference --------------------------------


def _conv1x1(x_ncl, w, b):
    y = jnp.einsum("oi,nil->nol", w, x_ncl, precision=lax.Precision.HIGHEST)
    return y + b[None, :, None]


def _latent_layer_ref(p, x_ncl, num_hidden):
    h = jnp.tanh(_conv1x1(x_ncl, p["w_in"], p["b_in"]))
    for j in range(num_hidden):
        h = jnp.tanh(_conv1x1(h, p["w_hid"][j], p["b_hid"][j]))
    return (_conv1x1(h, p["w_o1"], p["b_o1"]),
            _conv1x1(h, p["w_o2"], p["b_o2"]))


def _posterior_sample_ref(mu_q_hat, logvar_q_hat, mu_p, logvar_p, eps):
    # Literal torch formulation (un-simplified), for the correctness check.
    logvar_q = jnp.log(1.0 / (jnp.exp(logvar_q_hat) ** -2
                              + jnp.exp(logvar_p) ** -2))
    mu_q = logvar_q * (mu_q_hat * jnp.sqrt(logvar_q_hat)
                       + mu_p * jnp.sqrt(logvar_p))
    std = jnp.exp(0.5 * logvar_q)
    return mu_q + eps * std


def inference_reference(params, d, mu_p, logvar_p, eps_list, num_hidden):
    nl = len(params)
    mu_q_hat, lv_q_hat = _latent_layer_ref(params[-1], d[-1], num_hidden)
    z = [_posterior_sample_ref(mu_q_hat, lv_q_hat, mu_p[-1], logvar_p[-1],
                               eps_list[0])]
    for s, i in enumerate(reversed(range(nl - 1)), start=1):
        x = jnp.concatenate([d[i], z[-1]], axis=1)
        mu_q_hat, lv_q_hat = _latent_layer_ref(params[i], x, num_hidden)
        z.append(_posterior_sample_ref(mu_q_hat, lv_q_hat, mu_p[i],
                                       logvar_p[i], eps_list[s]))
    return z


# ---------------------------------- main ------------------------------------------


if __name__ == "__main__":
    tcn_channels = [16, 8]
    latent_channels = [8, 4]
    num_hidden_layers = 2
    N, L = 2, 128
    nl = len(tcn_channels)

    key = jax.random.PRNGKey(0)
    params = init_params(key, tcn_channels, latent_channels, num_hidden_layers)

    # inputs (PyTorch NCL layout)
    d, mu_p, logvar_p = [], [], []
    for i in range(nl):
        key, k1, k2, k3 = jax.random.split(key, 4)
        d.append(jax.random.normal(k1, (N, tcn_channels[i], L), jnp.float32))
        mu_p.append(0.5 * jax.random.normal(k2, (N, latent_channels[i], L),
                                            jnp.float32))
        # keep logvar_p > 0 so sqrt(logvar_p) (as written in the module) is real
        logvar_p.append(0.2 + 0.3 * jnp.abs(
            jax.random.normal(k3, (N, latent_channels[i], L), jnp.float32)))

    # reparameterization noise, one per layer in processing order (top first)
    order = [nl - 1] + list(reversed(range(nl - 1)))
    eps_list = []
    for idx in order:
        key, ke = jax.random.split(key)
        eps_list.append(jax.random.normal(
            ke, (N, latent_channels[idx], L), jnp.float32))

    z_out = inference_forward(params, d, mu_p, logvar_p, eps_list,
                              num_hidden_layers)
    z_out = jax.block_until_ready(z_out)

    z_ref = jax.block_until_ready(
        inference_reference(params, d, mu_p, logvar_p, eps_list,
                            num_hidden_layers))

    assert len(z_out) == nl
    for s, idx in enumerate(order):
        assert z_out[s].shape == (N, latent_channels[idx], L), z_out[s].shape
        err = float(jnp.max(jnp.abs(z_out[s] - z_ref[s])))
        assert jnp.allclose(z_out[s], z_ref[s], atol=1e-4, rtol=1e-4), (s, err)

    print("KERNEL_OK")
</pallas_src>

<mosaic_0001>
module attributes {stable_mosaic.version = 11 : i64} {
  func.func @kernel(%arg0: i32, %arg1: memref<152x16xf32, #tpu.memory_space<vmem>>, %arg2: memref<8x256xf32, #tpu.memory_space<vmem>>, %arg3: memref<4x256xf32, #tpu.memory_space<vmem>>, %arg4: memref<4x256xf32, #tpu.memory_space<vmem>>, %arg5: memref<4x256xf32, #tpu.memory_space<vmem>>, %arg6: memref<16x256xf32, #tpu.memory_space<vmem>>, %arg7: memref<8x256xf32, #tpu.memory_space<vmem>>, %arg8: memref<8x256xf32, #tpu.memory_space<vmem>>, %arg9: memref<8x256xf32, #tpu.memory_space<vmem>>, %arg10: memref<4x256xf32, #tpu.memory_space<vmem>>, %arg11: memref<8x256xf32, #tpu.memory_space<vmem>>) attributes {dimension_semantics = [#tpu.dimension_semantics<arbitrary>], iteration_bounds = array<i64: 1>, scalar_prefetch = 0 : i64, scratch_operands = 0 : i64, tpu.core_type = #tpu.core_type<tc>, window_params = [{pipeline_mode = #tpu.pipeline_mode<synchronous>, transform_indices = @transform_0, window_bounds = array<i64: 152, 16>}, {transform_indices = @transform_1, window_bounds = array<i64: 8, 256>}, {transform_indices = @transform_2, window_bounds = array<i64: 4, 256>}, {transform_indices = @transform_3, window_bounds = array<i64: 4, 256>}, {transform_indices = @transform_4, window_bounds = array<i64: 4, 256>}, {transform_indices = @transform_5, window_bounds = array<i64: 16, 256>}, {transform_indices = @transform_6, window_bounds = array<i64: 8, 256>}, {transform_indices = @transform_7, window_bounds = array<i64: 8, 256>}, {transform_indices = @transform_8, window_bounds = array<i64: 8, 256>}, {transform_indices = @transform_9, window_bounds = array<i64: 4, 256>}, {transform_indices = @transform_10, window_bounds = array<i64: 8, 256>}]} {
    %c0 = arith.constant 0 : index
    %c0_0 = arith.constant 0 : index
    %0 = vector.load %arg1[%c0, %c0_0] : memref<152x16xf32, #tpu.memory_space<vmem>>, vector<4x8xf32>
    %c0_1 = arith.constant 0 : index
    %c0_2 = arith.constant 0 : index
    %1 = vector.load %arg2[%c0_1, %c0_2] : memref<8x256xf32, #tpu.memory_space<vmem>>, vector<8x256xf32>
    %cst = arith.constant dense<0.000000e+00> : vector<4x256xf32>
    %2 = tpu.matmul %0, %1, %cst {dimension_numbers = #tpu.dot_dimension_numbers<[1], [0], [0], [1], [0, 0, 1, 1], [], []>} : vector<4x8xf32>, vector<8x256xf32>, vector<4x256xf32> -> vector<4x256xf32>
    %c8 = arith.constant 8 : index
    %c0_3 = arith.constant 0 : index
    %3 = vector.load %arg1[%c8, %c0_3] : memref<152x16xf32, #tpu.memory_space<vmem>>, vector<4x1xf32>
    %4 = vector.broadcast %3 : vector<4x1xf32> to vector<4x256xf32>
    %5 = arith.addf %2, %4 : vector<4x256xf32>
    %6 = math.tanh %5 : vector<4x256xf32>
    %c16 = arith.constant 16 : index
    %c0_4 = arith.constant 0 : index
    %7 = vector.load %arg1[%c16, %c0_4] : memref<152x16xf32, #tpu.memory_space<vmem>>, vector<4x4xf32>
    %cst_5 = arith.constant dense<0.000000e+00> : vector<4x256xf32>
    %8 = tpu.matmul %7, %6, %cst_5 {dimension_numbers = #tpu.dot_dimension_numbers<[1], [0], [0], [1], [0, 0, 1, 1], [], []>} : vector<4x4xf32>, vector<4x256xf32>, vector<4x256xf32> -> vector<4x256xf32>
    %c24 = arith.constant 24 : index
    %c0_6 = arith.constant 0 : index
    %9 = vector.load %arg1[%c24, %c0_6] : memref<152x16xf32, #tpu.memory_space<vmem>>, vector<4x1xf32>
    %10 = vector.broadcast %9 : vector<4x1xf32> to vector<4x256xf32>
    %11 = arith.addf %8, %10 : vector<4x256xf32>
    %12 = math.tanh %11 : vector<4x256xf32>
    %c32 = arith.constant 32 : index
    %c0_7 = arith.constant 0 : index
    %13 = vector.load %arg1[%c32, %c0_7] : memref<152x16xf32, #tpu.memory_space<vmem>>, vector<4x4xf32>
    %cst_8 = arith.constant dense<0.000000e+00> : vector<4x256xf32>
    %14 = tpu.matmul %13, %12, %cst_8 {dimension_numbers = #tpu.dot_dimension_numbers<[1], [0], [0], [1], [0, 0, 1, 1], [], []>} : vector<4x4xf32>, vector<4x256xf32>, vector<4x256xf32> -> vector<4x256xf32>
    %c40 = arith.constant 40 : index
    %c0_9 = arith.constant 0 : index
    %15 = vector.load %arg1[%c40, %c0_9] : memref<152x16xf32, #tpu.memory_space<vmem>>, vector<4x1xf32>
    %16 = vector.broadcast %15 : vector<4x1xf32> to vector<4x256xf32>
    %17 = arith.addf %14, %16 : vector<4x256xf32>
    %18 = math.tanh %17 : vector<4x256xf32>
    %c48 = arith.constant 48 : index
    %c0_10 = arith.constant 0 : index
    %19 = vector.load %arg1[%c48, %c0_10] : memref<152x16xf32, #tpu.memory_space<vmem>>, vector<8x4xf32>
    %cst_11 = arith.constant dense<0.000000e+00> : vector<8x256xf32>
    %20 = tpu.matmul %19, %18, %cst_11 {dimension_numbers = #tpu.dot_dimension_numbers<[1], [0], [0], [1], [0, 0, 1, 1], [], []>} : vector<8x4xf32>, vector<4x256xf32>, vector<8x256xf32> -> vector<8x256xf32>
    %c56 = arith.constant 56 : index
    %c0_12 = arith.constant 0 : index
    %21 = vector.load %arg1[%c56, %c0_12] : memref<152x16xf32, #tpu.memory_space<vmem>>, vector<8x1xf32>
    %22 = vector.broadcast %21 : vector<8x1xf32> to vector<8x256xf32>
    %23 = arith.addf %20, %22 : vector<8x256xf32>
    %24 = vector.extract_strided_slice %23 {offsets = [0, 0], sizes = [4, 256], strides = [1, 1]} : vector<8x256xf32> to vector<4x256xf32>
    %25 = vector.extract_strided_slice %23 {offsets = [4, 0], sizes = [4, 256], strides = [1, 1]} : vector<8x256xf32> to vector<4x256xf32>
    %c0_13 = arith.constant 0 : index
    %c0_14 = arith.constant 0 : index
    %26 = vector.load %arg3[%c0_13, %c0_14] : memref<4x256xf32, #tpu.memory_space<vmem>>, vector<4x256xf32>
    %c0_15 = arith.constant 0 : index
    %c0_16 = arith.constant 0 : index
    %27 = vector.load %arg4[%c0_15, %c0_16] : memref<4x256xf32, #tpu.memory_space<vmem>>, vector<4x256xf32>
    %c0_17 = arith.constant 0 : index
    %c0_18 = arith.constant 0 : index
    %28 = vector.load %arg5[%c0_17, %c0_18] : memref<4x256xf32, #tpu.memory_space<vmem>>, vector<4x256xf32>
    %cst_19 = arith.constant -2.000000e+00 : f32
    %29 = vector.broadcast %cst_19 : f32 to vector<4x256xf32>
    %30 = arith.mulf %29, %25 : vector<4x256xf32>
    %31 = math.exp %30 : vector<4x256xf32>
    %cst_20 = arith.constant -2.000000e+00 : f32
    %32 = vector.broadcast %cst_20 : f32 to vector<4x256xf32>
    %33 = arith.mulf %32, %27 : vector<4x256xf32>
    %34 = math.exp %33 : vector<4x256xf32>
    %35 = arith.addf %31, %34 : vector<4x256xf32>
    %36 = math.log %35 : vector<4x256xf32>
    %cst_21 = arith.constant 0.000000e+00 : f32
    %37 = vector.broadcast %cst_21 : f32 to vector<4x256xf32>
    %38 = arith.subf %37, %36 : vector<4x256xf32>
    %39 = math.sqrt %25 : vector<4x256xf32>
    %40 = arith.mulf %24, %39 : vector<4x256xf32>
    %41 = math.sqrt %27 : vector<4x256xf32>
    %42 = arith.mulf %26, %41 : vector<4x256xf32>
    %43 = arith.addf %40, %42 : vector<4x256xf32>
    %44 = arith.mulf %38, %43 : vector<4x256xf32>
    %45 = math.rsqrt %35 : vector<4x256xf32>
    %46 = arith.mulf %28, %45 : vector<4x256xf32>
    %47 = arith.addf %44, %46 : vector<4x256xf32>
    %c0_22 = arith.constant 0 : index
    %c0_23 = arith.constant 0 : index
    %48 = vector.load %arg10[%c0_22, %c0_23] : memref<4x256xf32, #tpu.memory_space<vmem>>, vector<4x256xf32>
    tpu.vector_store %arg10[%c0_22, %c0_23], %47 {strides = array<i32>} : memref<4x256xf32, #tpu.memory_space<vmem>>, vector<4x256xf32>,
    %c64 = arith.constant 64 : index
    %c0_24 = arith.constant 0 : index
    %49 = vector.load %arg1[%c64, %c0_24] : memref<152x16xf32, #tpu.memory_space<vmem>>, vector<8x16xf32>
    %c0_25 = arith.constant 0 : index
    %c0_26 = arith.constant 0 : index
    %50 = vector.load %arg6[%c0_25, %c0_26] : memref<16x256xf32, #tpu.memory_space<vmem>>, vector<16x256xf32>
    %cst_27 = arith.constant dense<0.000000e+00> : vector<8x256xf32>
    %51 = tpu.matmul %49, %50, %cst_27 {dimension_numbers = #tpu.dot_dimension_numbers<[1], [0], [0], [1], [0, 0, 1, 1], [], []>} : vector<8x16xf32>, vector<16x256xf32>, vector<8x256xf32> -> vector<8x256xf32>
    %c72 = arith.constant 72 : index
    %c0_28 = arith.constant 0 : index
    %52 = vector.load %arg1[%c72, %c0_28] : memref<152x16xf32, #tpu.memory_space<vmem>>, vector<8x4xf32>
    %cst_29 = arith.constant dense<0.000000e+00> : vector<8x256xf32>
    %53 = tpu.matmul %52, %47, %cst_29 {dimension_numbers = #tpu.dot_dimension_numbers<[1], [0], [0], [1], [0, 0, 1, 1], [], []>} : vector<8x4xf32>, vector<4x256xf32>, vector<8x256xf32> -> vector<8x256xf32>
    %54 = arith.addf %51, %53 : vector<8x256xf32>
    %c80 = arith.constant 80 : index
    %c0_30 = arith.constant 0 : index
    %55 = vector.load %arg1[%c80, %c0_30] : memref<152x16xf32, #tpu.memory_space<vmem>>, vector<8x1xf32>
    %56 = vector.broadcast %55 : vector<8x1xf32> to vector<8x256xf32>
    %57 = arith.addf %54, %56 : vector<8x256xf32>
    %58 = math.tanh %57 : vector<8x256xf32>
    %c88 = arith.constant 88 : index
    %c0_31 = arith.constant 0 : index
    %59 = vector.load %arg1[%c88, %c0_31] : memref<152x16xf32, #tpu.memory_space<vmem>>, vector<8x8xf32>
    %cst_32 = arith.constant dense<0.000000e+00> : vector<8x256xf32>
    %60 = tpu.matmul %59, %58, %cst_32 {dimension_numbers = #tpu.dot_dimension_numbers<[1], [0], [0], [1], [0, 0, 1, 1], [], []>} : vector<8x8xf32>, vector<8x256xf32>, vector<8x256xf32> -> vector<8x256xf32>
    %c96 = arith.constant 96 : index
    %c0_33 = arith.constant 0 : index
    %61 = vector.load %arg1[%c96, %c0_33] : memref<152x16xf32, #tpu.memory_space<vmem>>, vector<8x1xf32>
    %62 = vector.broadcast %61 : vector<8x1xf32> to vector<8x256xf32>
    %63 = arith.addf %60, %62 : vector<8x256xf32>
    %64 = math.tanh %63 : vector<8x256xf32>
    %c104 = arith.constant 104 : index
    %c0_34 = arith.constant 0 : index
    %65 = vector.load %arg1[%c104, %c0_34] : memref<152x16xf32, #tpu.memory_space<vmem>>, vector<8x8xf32>
    %cst_35 = arith.constant dense<0.000000e+00> : vector<8x256xf32>
    %66 = tpu.matmul %65, %64, %cst_35 {dimension_numbers = #tpu.dot_dimension_numbers<[1], [0], [0], [1], [0, 0, 1, 1], [], []>} : vector<8x8xf32>, vector<8x256xf32>, vector<8x256xf32> -> vector<8x256xf32>
    %c112 = arith.constant 112 : index
    %c0_36 = arith.constant 0 : index
    %67 = vector.load %arg1[%c112, %c0_36] : memref<152x16xf32, #tpu.memory_space<vmem>>, vector<8x1xf32>
    %68 = vector.broadcast %67 : vector<8x1xf32> to vector<8x256xf32>
    %69 = arith.addf %66, %68 : vector<8x256xf32>
    %70 = math.tanh %69 : vector<8x256xf32>
    %c120 = arith.constant 120 : index
    %c0_37 = arith.constant 0 : index
    %71 = vector.load %arg1[%c120, %c0_37] : memref<152x16xf32, #tpu.memory_space<vmem>>, vector<16x8xf32>
    %cst_38 = arith.constant dense<0.000000e+00> : vector<16x256xf32>
    %72 = tpu.matmul %71, %70, %cst_38 {dimension_numbers = #tpu.dot_dimension_numbers<[1], [0], [0], [1], [0, 0, 1, 1], [], []>} : vector<16x8xf32>, vector<8x256xf32>, vector<16x256xf32> -> vector<16x256xf32>
    %c136 = arith.constant 136 : index
    %c0_39 = arith.constant 0 : index
    %73 = vector.load %arg1[%c136, %c0_39] : memref<152x16xf32, #tpu.memory_space<vmem>>, vector<16x1xf32>
    %74 = vector.broadcast %73 : vector<16x1xf32> to vector<16x256xf32>
    %75 = arith.addf %72, %74 : vector<16x256xf32>
    %76 = vector.extract_strided_slice %75 {offsets = [0, 0], sizes = [8, 256], strides = [1, 1]} : vector<16x256xf32> to vector<8x256xf32>
    %77 = vector.extract_strided_slice %75 {offsets = [8, 0], sizes = [8, 256], strides = [1, 1]} : vector<16x256xf32> to vector<8x256xf32>
    %c0_40 = arith.constant 0 : index
    %c0_41 = arith.constant 0 : index
    %78 = vector.load %arg7[%c0_40, %c0_41] : memref<8x256xf32, #tpu.memory_space<vmem>>, vector<8x256xf32>
    %c0_42 = arith.constant 0 : index
    %c0_43 = arith.constant 0 : index
    %79 = vector.load %arg8[%c0_42, %c0_43] : memref<8x256xf32, #tpu.memory_space<vmem>>, vector<8x256xf32>
    %c0_44 = arith.constant 0 : index
    %c0_45 = arith.constant 0 : index
    %80 = vector.load %arg9[%c0_44, %c0_45] : memref<8x256xf32, #tpu.memory_space<vmem>>, vector<8x256xf32>
    %cst_46 = arith.constant -2.000000e+00 : f32
    %81 = vector.broadcast %cst_46 : f32 to vector<8x256xf32>
    %82 = arith.mulf %81, %77 : vector<8x256xf32>
    %83 = math.exp %82 : vector<8x256xf32>
    %cst_47 = arith.constant -2.000000e+00 : f32
    %84 = vector.broadcast %cst_47 : f32 to vector<8x256xf32>
    %85 = arith.mulf %84, %79 : vector<8x256xf32>
    %86 = math.exp %85 : vector<8x256xf32>
    %87 = arith.addf %83, %86 : vector<8x256xf32>
    %88 = math.log %87 : vector<8x256xf32>
    %cst_48 = arith.constant 0.000000e+00 : f32
    %89 = vector.broadcast %cst_48 : f32 to vector<8x256xf32>
    %90 = arith.subf %89, %88 : vector<8x256xf32>
    %91 = math.sqrt %77 : vector<8x256xf32>
    %92 = arith.mulf %76, %91 : vector<8x256xf32>
    %93 = math.sqrt %79 : vector<8x256xf32>
    %94 = arith.mulf %78, %93 : vector<8x256xf32>
    %95 = arith.addf %92, %94 : vector<8x256xf32>
    %96 = arith.mulf %90, %95 : vector<8x256xf32>
    %97 = math.rsqrt %87 : vector<8x256xf32>
    %98 = arith.mulf %80, %97 : vector<8x256xf32>
    %99 = arith.addf %96, %98 : vector<8x256xf32>
    %c0_49 = arith.constant 0 : index
    %c0_50 = arith.constant 0 : index
    %100 = vector.load %arg11[%c0_49, %c0_50] : memref<8x256xf32, #tpu.memory_space<vmem>>, vector<8x256xf32>
    tpu.vector_store %arg11[%c0_49, %c0_50], %99 {strides = array<i32>} : memref<8x256xf32, #tpu.memory_space<vmem>>, vector<8x256xf32>,
    return
  }
  func.func @transform_0(%arg0: i32) -> (i32, i32) {
    %c0_i32 = arith.constant 0 : i32
    %c0_i32_0 = arith.constant 0 : i32
    %c0_i32_1 = arith.constant 0 : i32
    return %c0_i32, %c0_i32_0 : i32, i32
  }
  func.func @transform_1(%arg0: i32) -> (i32, i32) {
    %c0_i32 = arith.constant 0 : i32
    %c0_i32_0 = arith.constant 0 : i32
    return %c0_i32, %arg0 : i32, i32
  }
  func.func @transform_2(%arg0: i32) -> (i32, i32) {
    %c0_i32 = arith.constant 0 : i32
    %c0_i32_0 = arith.constant 0 : i32
    return %c0_i32, %arg0 : i32, i32
  }
  func.func @transform_3(%arg0: i32) -> (i32, i32) {
    %c0_i32 = arith.constant 0 : i32
    %c0_i32_0 = arith.constant 0 : i32
    return %c0_i32, %arg0 : i32, i32
  }
  func.func @transform_4(%arg0: i32) -> (i32, i32) {
    %c0_i32 = arith.constant 0 : i32
    %c0_i32_0 = arith.constant 0 : i32
    return %c0_i32, %arg0 : i32, i32
  }
  func.func @transform_5(%arg0: i32) -> (i32, i32) {
    %c0_i32 = arith.constant 0 : i32
    %c0_i32_0 = arith.constant 0 : i32
    return %c0_i32, %arg0 : i32, i32
  }
  func.func @transform_6(%arg0: i32) -> (i32, i32) {
    %c0_i32 = arith.constant 0 : i32
    %c0_i32_0 = arith.constant 0 : i32
    return %c0_i32, %arg0 : i32, i32
  }
  func.func @transform_7(%arg0: i32) -> (i32, i32) {
    %c0_i32 = arith.constant 0 : i32
    %c0_i32_0 = arith.constant 0 : i32
    return %c0_i32, %arg0 : i32, i32
  }
  func.func @transform_8(%arg0: i32) -> (i32, i32) {
    %c0_i32 = arith.constant 0 : i32
    %c0_i32_0 = arith.constant 0 : i32
    return %c0_i32, %arg0 : i32, i32
  }
  func.func @transform_9(%arg0: i32) -> (i32, i32) {
    %c0_i32 = arith.constant 0 : i32
    %c0_i32_0 = arith.constant 0 : i32
    return %c0_i32, %arg0 : i32, i32
  }
  func.func @transform_10(%arg0: i32) -> (i32, i32) {
    %c0_i32 = arith.constant 0 : i32
    %c0_i32_0 = arith.constant 0 : i32
    return %c0_i32, %arg0 : i32, i32
  }
}

</mosaic_0001>

<bundles_post_ra>
// kernel: tpu_custom_call.1
= control target key start
LH: loop header
LB: loop body
LE: loop exit
PB: predicated region body
PF: predicated region fallthrough
CT: control target
= control target key end

     0   :  { %16 = vsyncpa [#allocation3], 0  ;;  %vm45_vm0 = vcmask 64512   ;;  %v1150_v3 = vmov 0.0   ;;  %v1151_v5 = vmov 0   ;;  %s1380_s0 = inlined_call_operand.vmem [shape: f32[152,16], index: 0, kind: input, shape index: {}]   ;;  %s1381_s1 = inlined_call_operand.vmem [shape: f32[8,256], index: 1, kind: input, shape index: {}]   ;;  %s1382_s2 = inlined_call_operand.vmem [shape: f32[4,256], index: 2, kind: input, shape index: {}]   ;;  %s1383_s3 = inlined_call_operand.vmem [shape: f32[4,256], index: 3, kind: input, shape index: {}]   ;;  %s1384_s4 = inlined_call_operand.vmem [shape: f32[4,256], index: 4, kind: input, shape index: {}]   ;;  %s1385_s5 = inlined_call_operand.vmem [shape: f32[16,256], index: 5, kind: input, shape index: {}]   ;;  %s1386_s6 = inlined_call_operand.vmem [shape: f32[8,256], index: 6, kind: input, shape index: {}]   ;;  %s1387_s7 = inlined_call_operand.vmem [shape: f32[8,256], index: 7, kind: input, shape index: {}]   ;;  %s1388_s8 = inlined_call_operand.vmem [shape: f32[8,256], index: 8, kind: input, shape index: {}]   ;;  %s1389_s9 = inlined_call_operand.hbm [shape: f32[4,256], index: 9, kind: output, shape index: {0}]   ;;  %s1390_s10 = inlined_call_operand.hbm [shape: f32[8,256], index: 10, kind: output, shape index: {1}]  }
   0x1   :  { %v38_v0 = vld [vmem:[%s1381_s1 + $0x8] sm:$0xff]  ;;  %v37_v1 = vld [vmem:[%s1381_s1] sm:$0xff]  ;;  %113 = vmatprep.mubr.f32.mxu1 %v1150_v3  ;;  %1032 = vset.pattern.permute.xlu0 %v1151_v5 }
   0x2   :  { %v36_v2 = vld [vmem:[%s1380_s0] sm:$0xf]  ;;  %49 = vmatprep.subr.mxu1 %v38_v0  ;;  %v39_v4 = vld [vmem:[%s1380_s0 + $0x8] sm:$0xf] }
   0x3   :  { %50 = vmatpush1.msra.mxu1 %v37_v1 }
   0x4   :  { %17 = vsyncpa [#allocation5], 0  ;;  %1004 = vmatmul.mubr.msk.f32.vlgmr.msra.gmra.mrb[0].mxu1 %vm45_vm0, %v36_v2  ;;  %42 = vperm.xlu0 %1032, %v39_v4   ;;  %v123_v6 = vld [vmem:[%s1380_s0 + $0x18] sm:$0xf]  ;;  %v633_v7 = vld [vmem:[%s1380_s0 + $0x50] sm:$0xff]  ;;  %vm133_vm1 = vcmask 1043456  }
   0x5   :  { %204 = vmatprep.mubr.f32.mxu1 %v1150_v3  ;;  %293 = vmatprep.mubr.f32.mxu0 %v1150_v3  ;;  %v727_v8 = vld [vmem:[%s1380_s0 + $0x70] sm:$0xff]  ;;  %v811_v9 = vld [vmem:[%s1380_s0 + $0x88] sm:$0xff]  ;;  %vm129_vm2 = vcmask 31744   ;;  %v303_v19 = vld [vmem:[%s1380_s0 + $0x38] sm:$0xff]  ;;  %vm558_vm9 = vcmask 130048   ;;  %s1152_s22 = smov [#allocation2]  }
   0x6   :  { %1033 = vset.pattern.permute.xlu1 %v1151_v5  ;;  %v122_v16 = vld [vmem:[%s1380_s0 + $0x10] sm:$0xf]  ;;  %v214_v18 = vld [vmem:[%s1380_s0 + $0x28] sm:$0xf]  ;;  %v644_v20 = vld [vmem:[%s1380_s0 + $0x60] sm:$0xff] }
   0x7   :  { %217 = vperm.xlu1 %1033, %v214_v18   ;;  %v812_v21 = vld [vmem:[%s1380_s0 + $0x90] sm:$0xff]  ;;  %v213_v28 = vld [vmem:[%s1380_s0 + $0x20] sm:$0xf] }
   0x8   :  { %126 = vperm.xlu0 %1032, %v123_v6   ;;  %v302_v36 = vld [vmem:[%s1380_s0 + $0x30] sm:$0xff]  ;;  %v390_v38 = vld [vmem:[%s1383_s3] sm:$0xff]  ;;  %s982_s3 = sshll.u32 %s1152_s22, 4  ;;  %s983_s3 = int_to_ptr.vmem [resolvable:$true] %s982_s3 }
   0x9   :  { %v398_v39 = vmul.f32 -2.0, %v390_v38  ;;  %vm436_vm3 = vcmp.eq.f32.partialorder %v390_v38, inf  ;;  %v439_v58 = vand.u32 2147483648, %v390_v38  ;;  %vm438_vm5 = vcmp.eq.f32.partialorder %v390_v38, 0.0  ;;  %v389_v2 = vld [vmem:[%s1382_s2] sm:$0xff]  ;;  %s1102_s23 = scalar_lea.vmem %s983_s3, 128  ;;  %p1107_p1 = scmp.lt.s32.totalorder %s983_s3, %s983_s3 }
   0xa   :  { %p1103_p0 = scmp.ne.s32.totalorder %s983_s3, %s1102_s23  ;;  %p1108_p2 = scmp.lt.s32.totalorder %s1102_s23, %s1102_s23 }
   0xb   :  { %306 = vperm.xlu1 %1033, %v303_v19   ;;  %v399_v40 = vmul.f32 1.442695, %v398_v39  ;;  %v391_v19 = vld [vmem:[%s1384_s4] sm:$0xff] }
   0xc   :  { %636 = vperm.xlu0 %1032, %v633_v7   ;;  %p1109_p3 = por %p1108_p2, %p1107_p1 }
   0xe   :  { %p1110_p4 = pnand %p1109_p3, %p1103_p0 }
   0xf   :  { %647 = vperm.xlu1 %1033, %v644_v20  }
  0x10   :  { %730 = vperm.xlu0 %1032, %v727_v8  }
  0x13   :  { %820 = vperm.xlu1 %1033, %v812_v21  }
  0x14   :  { %815 = vperm.xlu0 %1032, %v811_v9  }
  0x83   :  { %v43_v10 = vpop.permute.xlu0 %42 }
  0x86   :  { %v218_v30 = vpop.permute.xlu1 %217 }
  0x87   :  { %v127_v22 = vpop.permute.xlu0 %126 }
  0x8a   :  { %v307_v41 = vpop.permute.xlu1 %306 }
  0xd7   :  { %v115_v11 = vpop.f32.mrb[0].mxu1 }
  0xd8   :  { %v116_v12 = vadd.f32 %v115_v11, %v43_v10  ;;  %v117_v13 = vpop.f32.mrb[1].mxu1 }
  0xd9   :  { %v118_v14 = vadd.f32 %v117_v13, %v43_v10 }
  0xdb   :  { %1034 = vtanh.f32 %v118_v14 }
  0xdc   :  { %1036 = vtanh.f32 %v116_v12 }
  0xe5   :  { %v1035_v15 = vpop.eup %1034 }
  0xe6   :  { %v1037_v17 = vpop.eup %1036  ;;  %1005 = vmatprep.subr.msk.mxu1 %vm133_vm1, %v1035_v15 }
  0xe7   :  { %1006 = vmatpush1.msk.msra.mxu1 %vm133_vm1, %v1037_v17 }
  0xe8   :  { %1007 = vmatmul.mubr.msk.f32.vlgmr.msra.gmra.mrb[2].mxu1 %vm129_vm2, %v122_v16 }
  0xe9   :  { %382 = vmatprep.mubr.f32.mxu1 %v1150_v3 }
 0x1bb   :  { %v206_v23 = vpop.f32.mrb[2].mxu1 }
 0x1bc   :  { %v207_v24 = vadd.f32 %v206_v23, %v127_v22  ;;  %v208_v25 = vpop.f32.mrb[3].mxu1 }
 0x1bd   :  { %v209_v26 = vadd.f32 %v208_v25, %v127_v22 }
 0x1bf   :  { %1038 = vtanh.f32 %v209_v26 }
 0x1c0   :  { %1040 = vtanh.f32 %v207_v24 }
 0x1c9   :  { %v1039_v27 = vpop.eup %1038 }
 0x1ca   :  { %v1041_v29 = vpop.eup %1040  ;;  %1008 = vmatprep.subr.msk.mxu0 %vm133_vm1, %v1039_v27 }
 0x1cb   :  { %1009 = vmatpush1.msk.msra.mxu0 %vm133_vm1, %v1041_v29 }
 0x1cc   :  { %1010 = vmatmul.mubr.msk.f32.vlgmr.msra.gmra.mrb[0].mxu0 %vm129_vm2, %v213_v28 }
 0x1cd   :  { %551 = vmatprep.mubr.f32.mxu0 %v1150_v3 }
 0x29f   :  { %v295_v31 = vpop.f32.mrb[0].mxu0 }
 0x2a0   :  { %v296_v32 = vadd.f32 %v295_v31, %v218_v30  ;;  %v297_v33 = vpop.f32.mrb[1].mxu0 }
 0x2a1   :  { %v298_v34 = vadd.f32 %v297_v33, %v218_v30 }
 0x2a3   :  { %1042 = vtanh.f32 %v298_v34  ;;  %v474_v34 = vld [vmem:[%s1385_s5 + $0x8] sm:$0xff] }
 0x2a4   :  { %1044 = vtanh.f32 %v296_v32 }
 0x2a5   :  { %1046 = vrsqrt.f32 %v390_v38 }
 0x2a6   :  { %1048 = vpow2.f32 %v399_v40 }
 0x2ad   :  { %v1043_v35 = vpop.eup %1042 }
 0x2ae   :  { %v1045_v37 = vpop.eup %1044  ;;  %1011 = vmatprep.subr.msk.mxu1 %vm133_vm1, %v1043_v35  ;;  %v476_v35 = vld [vmem:[%s1385_s5 + $0x18] sm:$0xff] }
 0x2af   :  { %1012 = vmatpush1.msk.msra.mxu1 %vm133_vm1, %v1045_v37  ;;  %v1047_v50 = vpop.eup %1046  ;;  %v475_v37 = vld [vmem:[%s1385_s5 + $0x10] sm:$0xff]  ;;  %v1022_v40 = vpack.c.bf16 %v476_v35, %v474_v34 }
 0x2b0   :  { %1013 = vmatmul.mubr.msk.f32.vlgmr.msra.gmra.mrb[4].mxu1 %vm129_vm2, %v302_v36  ;;  %v1049_v51 = vpop.eup %1048  ;;  %v435_v52 = vmul.f32 %v1047_v50, %v390_v38  ;;  %v473_v36 = vld [vmem:[%s1385_s5] sm:$0xff] }
 0x2b1   :  { %717 = vmatprep.mubr.f32.mxu1 %v1150_v3  ;;  %v402_v55 = vcombine.low %v1049_v51, %v1049_v51 }
 0x2b2   :  { %v437_v59 = vsel %vm436_vm3, %v390_v38, %v435_v52  ;;  %v643_v52 = vld [vmem:[%s1380_s0 + $0x58] sm:$0xff] }
 0x2b3   :  { %v440_v6 = vsel %vm438_vm5, %v439_v58, %v437_v59 }
 0x2b4   :  { %v441_v10 = vmul.f32 %v440_v6, %v389_v2 }
 0x2b6   :  { %v443_v13 = vcombine.high %v441_v10, %v441_v10 }
 0x383   :  { %v384_v42 = vpop.f32.mrb[4].mxu1 }
 0x384   :  { %v385_v43 = vadd.f32 %v384_v42, %v307_v41  ;;  %v386_v44 = vpop.f32.mrb[5].mxu1  ;;  %v477_v42 = vld [vmem:[%s1380_s0 + $0x48] sm:$0xff] }
 0x385   :  { %v387_v45 = vadd.f32 %v386_v44, %v307_v41 }
 0x386   :  { %v392_v46 = vmul.f32 -2.0, %v385_v43  ;;  %1050 = vrsqrt.f32 %v385_v43  ;;  %vm414_vm6 = vcmp.eq.f32.partialorder %v385_v43, inf  ;;  %v417_v7 = vand.u32 2147483648, %v385_v43 }
 0x387   :  { %1052 = vrsqrt.f32 %v387_v45  ;;  %v393_v47 = vmul.f32 -2.0, %v387_v45  ;;  %vm421_vm4 = vcmp.eq.f32.partialorder %v387_v45, inf  ;;  %v424_v62 = vand.u32 2147483648, %v387_v45 }
 0x388   :  { %v394_v48 = vmul.f32 1.442695, %v392_v46  ;;  %vm423_vm7 = vcmp.eq.f32.partialorder %v387_v45, 0.0  ;;  %vm416_vm8 = vcmp.eq.f32.partialorder %v385_v43, 0.0  ;;  %v637_v46 = vpop.permute.xlu0 %636 }
 0x389   :  { %v396_v49 = vmul.f32 1.442695, %v393_v47 }
 0x38a   :  { %1054 = vpow2.f32 %v394_v48 }
 0x38b   :  { %1056 = vpow2.f32 %v396_v49 }
 0x390   :  { %v1051_v53 = vpop.eup %1050 }
 0x391   :  { %v1053_v54 = vpop.eup %1052  ;;  %v413_v56 = vmul.f32 %v1051_v53, %v385_v43 }
 0x392   :  { %v420_v57 = vmul.f32 %v1053_v54, %v387_v45  ;;  %v648_v54 = vpop.permute.xlu1 %647 }
 0x393   :  { %v415_v1 = vsel %vm414_vm6, %v385_v43, %v413_v56 }
 0x394   :  { %v1055_v60 = vpop.eup %1054  ;;  %v422_v61 = vsel %vm421_vm4, %v387_v45, %v420_v57  ;;  %v418_v8 = vsel %vm416_vm8, %v417_v7, %v415_v1  ;;  %v810_v7 = vld [vmem:[%s1380_s0 + $0x80] sm:$0xff] }
 0x395   :  { %v1057_v63 = vpop.eup %1056  ;;  %v404_v0 = vadd.f32 %v1055_v60, %v402_v55  ;;  %v425_v5 = vsel %vm423_vm7, %v424_v62, %v422_v61  ;;  %v428_v11 = vrot.slane %v418_v8, 4  ;;  %v726_v60 = vld [vmem:[%s1380_s0 + $0x68] sm:$0xff]  ;;  %v731_v62 = vpop.permute.xlu0 %730 }
 0x396   :  { %v405_v4 = vadd.f32 %v1057_v63, %v1049_v51  ;;  %v429_v9 = vrot.slane %v425_v5, 4  ;;  %v809_v5 = vld [vmem:[%s1380_s0 + $0x78] sm:$0xff] }
 0x397   :  { %1058 = vrsqrt.f32 %v404_v0  ;;  %v432_v14 = vmul.f32 %v428_v11, %v385_v43  ;;  %v1024_v43 = vpack.c.bf16 %v475_v37, %v473_v36 }
 0x398   :  { %1060 = vlog2.f32 %v405_v4  ;;  %v433_v12 = vmul.f32 %v429_v9, %v387_v45  ;;  %v472_v45 = vld [vmem:[%s1380_s0 + $0x40] sm:$0xff] }
 0x399   :  { %1062 = vrsqrt.f32 %v405_v4  ;;  %v445_v21 = vadd.f32 %v441_v10, %v432_v14 }
 0x39a   :  { %1064 = vlog2.f32 %v404_v0  ;;  %v446_v16 = vadd.f32 %v443_v13, %v433_v12 }
 0x39b   :  { %v449_v30 = vrot.slane %v445_v21, 4 }
 0x39c   :  { %v450_v25 = vrot.slane %v446_v16, 4 }
 0x3a1   :  { %v1059_v15 = vpop.eup %1058 }
 0x3a2   :  { %v1061_v17 = vpop.eup %1060 }
 0x3a3   :  { %v1063_v18 = vpop.eup %1062  ;;  %v409_v20 = vmul.f32 0.6931472, %v1061_v17 }
 0x3a4   :  { %v1065_v22 = vpop.eup %1064  ;;  %v459_v23 = vcombine.high %v1059_v15, %v1063_v18 }
 0x3a5   :  { %v411_v24 = vsub.f32 0.0, %v409_v20  ;;  %v407_v26 = vmul.f32 0.6931472, %v1065_v22 }
 0x3a6   :  { %v461_v27 = vmul.f32 %v459_v23, %v391_v19 }
 0x3a7   :  { %v454_v28 = vmul.f32 %v450_v25, %v411_v24  ;;  %v410_v29 = vsub.f32 0.0, %v407_v26 }
 0x3a8   :  { %v463_v31 = vcombine.low %v461_v27, %v461_v27 }
 0x3a9   :  { %v466_v32 = vadd.f32 %v461_v27, %v454_v28  ;;  %v453_v33 = vmul.f32 %v449_v30, %v410_v29 }
 0x3ab   :  { %v479_v38 = vrot.slane %v466_v32, 4  ;;  %v465_v39 = vadd.f32 %v463_v31, %v453_v33 }
 0x3ad   :  { %1014 = vmatprep.subr.msk.mxu0 %vm133_vm1, %v479_v38  ;;  %v478_v41 = vrot.slane %v465_v39, 4  ;;  %v469_v44 = vcombine.high %v465_v39, %v466_v32 }
 0x3af   :  { %1015 = vmatpush1.msk.msra.mxu0 %vm133_vm1, %v478_v41  ;;  %471 = vst [vmem:[#allocation2] sm:$0xff] %v469_v44 }
 0x3b0   :  { %1016 = vmatmul.mubr.msk.f32.vlgmr.msra.gmra.mrb[2].mxu0 %vm129_vm2, %v477_v42  ;;  %1023 = vmatprep.subr.bf16.mxu0 %v1022_v40 }
 0x3b1   :  { %1025 = vmatpush1.bf16.msra.mxu0 %v1024_v43  ;;  %626 = vmatprep.mubr.f32.mxu0 %v1150_v3 }
 0x3b8   :  { %1017 = vmatmul.mubr.msk.f32.vlgmr.msra.gmra.mrb[2].mxu0 %vm558_vm9, %v472_v45 }
 0x3b9   :  { %893 = vmatprep.mubr.f32.mxu0 %v1150_v3 }
 0x48b   :  { %v628_v47 = vpop.f32.mrb[2].mxu0 }
 0x48c   :  { %v639_v48 = vadd.f32 %v637_v46, %v628_v47  ;;  %v630_v49 = vpop.f32.mrb[3].mxu0 }
 0x48d   :  { %v640_v50 = vadd.f32 %v637_v46, %v630_v49 }
 0x48f   :  { %1066 = vtanh.f32 %v640_v50 }
 0x490   :  { %1068 = vtanh.f32 %v639_v48 }
 0x499   :  { %v1067_v51 = vpop.eup %1066 }
 0x49a   :  { %v1069_v53 = vpop.eup %1068  ;;  %653 = vmatprep.subr.mxu1 %v1067_v51 }
 0x49b   :  { %654 = vmatpush1.msra.mxu1 %v1069_v53 }
 0x49c   :  { %1018 = vmatmul.mubr.msk.f32.vlgmr.msra.gmra.mrb[6].mxu1 %vm45_vm0, %v643_v52 }
 0x49d   :  { %800 = vmatprep.mubr.f32.mxu1 %v1150_v3 }
 0x56f   :  { %v719_v55 = vpop.f32.mrb[6].mxu1 }
 0x570   :  { %v720_v56 = vadd.f32 %v719_v55, %v648_v54  ;;  %v721_v57 = vpop.f32.mrb[7].mxu1 }
 0x571   :  { %v722_v58 = vadd.f32 %v721_v57, %v648_v54 }
 0x573   :  { %1070 = vtanh.f32 %v722_v58 }
 0x574   :  { %1072 = vtanh.f32 %v720_v56 }
 0x57d   :  { %v1071_v59 = vpop.eup %1070 }
 0x57e   :  { %v1073_v61 = vpop.eup %1072  ;;  %736 = vmatprep.subr.mxu1 %v1071_v59 }
 0x57f   :  { %737 = vmatpush1.msra.mxu1 %v1073_v61 }
 0x580   :  { %1019 = vmatmul.mubr.msk.f32.vlgmr.msra.gmra.mrb[8].mxu1 %vm45_vm0, %v726_v60 }
 0x653   :  { %v802_v63 = vpop.f32.mrb[8].mxu1 }
 0x654   :  { %v803_v0 = vadd.f32 %v802_v63, %v731_v62  ;;  %v804_v1 = vpop.f32.mrb[9].mxu1 }
 0x655   :  { %v805_v2 = vadd.f32 %v804_v1, %v731_v62 }
 0x657   :  { %1074 = vtanh.f32 %v805_v2 }
 0x658   :  { %1076 = vtanh.f32 %v803_v0 }
 0x661   :  { %v1075_v4 = vpop.eup %1074 }
 0x662   :  { %v1077_v6 = vpop.eup %1076  ;;  %829 = vmatprep.subr.mxu0 %v1075_v4 }
 0x663   :  { %830 = vmatpush1.msra.mxu0 %v1077_v6 }
 0x664   :  { %1020 = vmatmul.mubr.msk.f32.vlgmr.msra.gmra.mrb[4].mxu0 %vm45_vm0, %v809_v5 }
 0x665   :  { %899 = vmatprep.mubr.f32.mxu0 %v1150_v3 }
 0x668   :  { %1021 = vmatmul.mubr.msk.f32.gmra.mrb[6].mxu0 %vm45_vm0, %v810_v7 }
 0x669   :  { %1113 = shalt.err (!%p1110_p4)
}
 0x66a   :  { %s1114_s25 = scalar_lea.hbm %s1389_s9, 128 }
 0x66b   :  { %p1115_p5 = scmp.ne.s32.totalorder %s1389_s9, %s1114_s25  ;;  %p1118_p6 = scmp.lt.u32.totalorder %s1114_s25, %s1389_s9 }
 0x66d   :  { %p1120_p7 = pnand %p1118_p6, %p1115_p5 }
 0x66f   :  { %1123 = shalt.err (!%p1120_p7)
}
 0x670   :  { %985 = dma.vmem_to_hbm [thread:$0]  %s983_s3, 128, %s1389_s9, [#allocation3]   ;;  %v1335_v3 = vld [vmem:[%s1387_s7] sm:$0xff]  ;;  %v1340_v8 = vld [vmem:[%s1387_s7 + $0x8] sm:$0xff]  ;;  %v821_v13 = vpop.permute.xlu1 %820  ;;  %v816_v28 = vpop.permute.xlu0 %815 }
 0x671   :  { %v918_v11 = vmul.f32 -2.0, %v1335_v3  ;;  %v919_v12 = vmul.f32 -2.0, %v1340_v8  ;;  %1078 = vrsqrt.f32 %v1335_v3  ;;  %vm950_vm14 = vcmp.eq.f32.partialorder %v1335_v3, inf  ;;  %v906_v53 = vld [vmem:[%s1386_s6] sm:$0xff]  ;;  %v907_v55 = vld [vmem:[%s1386_s6 + $0x8] sm:$0xff]  ;;  %s1153_s6 = smov [#allocation4]  }
 0x672   :  { %1080 = vrsqrt.f32 %v1340_v8  ;;  %vm957_vm15 = vcmp.eq.f32.partialorder %v1340_v8, inf  ;;  %v953_v49 = vand.u32 2147483648, %v1335_v3  ;;  %vm952_vm0 = vcmp.eq.f32.partialorder %v1335_v3, 0.0  ;;  %v910_v63 = vld [vmem:[%s1388_s8] sm:$0xff]  ;;  %v911_v2 = vld [vmem:[%s1388_s8 + $0x8] sm:$0xff]  ;;  %s992_s19 = sshll.u32 %s1153_s6, 4  ;;  %s993_s19 = int_to_ptr.vmem [resolvable:$true] %s992_s19 }
 0x673   :  { %v920_v17 = vmul.f32 1.442695, %v918_v11  ;;  %v922_v19 = vmul.f32 1.442695, %v919_v12  ;;  %v960_v51 = vand.u32 2147483648, %v1340_v8  ;;  %vm959_vm1 = vcmp.eq.f32.partialorder %v1340_v8, 0.0  ;;  %p1129_p9 = scmp.lt.s32.totalorder %s993_s19, %s993_s19 }
 0x674   :  { %s1124_s20 = scalar_lea.vmem %s993_s19, 256 }
 0x675   :  { %p1125_p8 = scmp.ne.s32.totalorder %s993_s19, %s1124_s20  ;;  %p1130_p10 = scmp.lt.s32.totalorder %s1124_s20, %s1124_s20 }
 0x677   :  { %p1131_p11 = por %p1130_p10, %p1129_p9 }
 0x679   :  { %p1132_p12 = pnand %p1131_p11, %p1125_p8 }
 0x67b   :  { %v1079_v24 = vpop.eup %1078 }
 0x67c   :  { %v1081_v25 = vpop.eup %1080  ;;  %v949_v47 = vmul.f32 %v1079_v24, %v1335_v3 }
 0x67d   :  { %v956_v48 = vmul.f32 %v1081_v25, %v1340_v8 }
 0x67e   :  { %v951_v50 = vsel %vm950_vm14, %v1335_v3, %v949_v47 }
 0x67f   :  { %v958_v52 = vsel %vm957_vm15, %v1340_v8, %v956_v48  ;;  %v954_v54 = vsel %vm952_vm0, %v953_v49, %v951_v50 }
 0x680   :  { %v961_v56 = vsel %vm959_vm1, %v960_v51, %v958_v52  ;;  %v962_v57 = vmul.f32 %v954_v54, %v906_v53 }
 0x681   :  { %v963_v59 = vmul.f32 %v961_v56, %v907_v55 }
 0x737   :  { %v895_v9 = vpop.f32.mrb[4].mxu0 }
 0x738   :  { %v897_v10 = vpop.f32.mrb[5].mxu0  ;;  %v896_v31 = vadd.f32 %v895_v9, %v816_v28 }
 0x739   :  { %v898_v38 = vadd.f32 %v897_v10, %v816_v28 }
 0x73b   :  { %v901_v14 = vpop.f32.mrb[6].mxu0 }
 0x73c   :  { %v902_v15 = vadd.f32 %v901_v14, %v821_v13  ;;  %v903_v16 = vpop.f32.mrb[7].mxu0 }
 0x73d   :  { %v904_v18 = vadd.f32 %v903_v16, %v821_v13 }
 0x73e   :  { %v912_v20 = vmul.f32 -2.0, %v902_v15  ;;  %1082 = vrsqrt.f32 %v902_v15  ;;  %vm934_vm10 = vcmp.eq.f32.partialorder %v902_v15, inf  ;;  %v937_v32 = vand.u32 2147483648, %v902_v15 }
 0x73f   :  { %v913_v21 = vmul.f32 -2.0, %v904_v18  ;;  %1084 = vrsqrt.f32 %v904_v18  ;;  %vm936_vm11 = vcmp.eq.f32.partialorder %v902_v15, 0.0  ;;  %vm941_vm12 = vcmp.eq.f32.partialorder %v904_v18, inf }
 0x740   :  { %v914_v22 = vmul.f32 1.442695, %v912_v20  ;;  %1086 = vpow2.f32 %v920_v17  ;;  %v944_v36 = vand.u32 2147483648, %v904_v18  ;;  %vm943_vm13 = vcmp.eq.f32.partialorder %v904_v18, 0.0 }
 0x741   :  { %v916_v23 = vmul.f32 1.442695, %v913_v21  ;;  %1088 = vpow2.f32 %v922_v19 }
 0x742   :  { %1090 = vpow2.f32 %v914_v22 }
 0x743   :  { %1092 = vpow2.f32 %v916_v23 }
 0x748   :  { %v1083_v26 = vpop.eup %1082 }
 0x749   :  { %v1085_v27 = vpop.eup %1084  ;;  %v933_v29 = vmul.f32 %v1083_v26, %v902_v15 }
 0x74a   :  { %v1087_v30 = vpop.eup %1086  ;;  %v940_v33 = vmul.f32 %v1085_v27, %v904_v18 }
 0x74b   :  { %v1089_v34 = vpop.eup %1088  ;;  %v935_v35 = vsel %vm934_vm10, %v902_v15, %v933_v29 }
 0x74c   :  { %v1091_v37 = vpop.eup %1090  ;;  %v938_v39 = vsel %vm936_vm11, %v937_v32, %v935_v35  ;;  %v942_v40 = vsel %vm941_vm12, %v904_v18, %v940_v33 }
 0x74d   :  { %v1093_v41 = vpop.eup %1092  ;;  %v924_v42 = vadd.f32 %v1091_v37, %v1087_v30  ;;  %v945_v43 = vsel %vm943_vm13, %v944_v36, %v942_v40  ;;  %v946_v44 = vmul.f32 %v938_v39, %v896_v31 }
 0x74e   :  { %v925_v45 = vadd.f32 %v1093_v41, %v1089_v34  ;;  %v947_v46 = vmul.f32 %v945_v43, %v898_v38 }
 0x74f   :  { %1094 = vlog2.f32 %v924_v42  ;;  %v964_v5 = vadd.f32 %v962_v57, %v946_v44 }
 0x750   :  { %1096 = vlog2.f32 %v925_v45  ;;  %v965_v7 = vadd.f32 %v963_v59, %v947_v46 }
 0x751   :  { %1098 = vrsqrt.f32 %v924_v42 }
 0x752   :  { %1100 = vrsqrt.f32 %v925_v45 }
 0x759   :  { %v1095_v58 = vpop.eup %1094 }
 0x75a   :  { %v1097_v60 = vpop.eup %1096  ;;  %v927_v61 = vmul.f32 0.6931472, %v1095_v58 }
 0x75b   :  { %v1099_v62 = vpop.eup %1098  ;;  %v929_v0 = vmul.f32 0.6931472, %v1097_v60 }
 0x75c   :  { %v1101_v1 = vpop.eup %1100  ;;  %v930_v4 = vsub.f32 0.0, %v927_v61  ;;  %v970_v8 = vmul.f32 %v1099_v62, %v910_v63 }
 0x75d   :  { %v931_v6 = vsub.f32 0.0, %v929_v0  ;;  %v971_v10 = vmul.f32 %v1101_v1, %v911_v2 }
 0x75e   :  { %v966_v3 = vmul.f32 %v964_v5, %v930_v4 }
 0x75f   :  { %v967_v9 = vmul.f32 %v965_v7, %v931_v6 }
 0x760   :  { %v972_v11 = vadd.f32 %v970_v8, %v966_v3 }
 0x761   :  { %v973_v12 = vadd.f32 %v971_v10, %v967_v9 }
 0x762   :  { %974 = vst [vmem:[#allocation4] sm:$0xff] %v972_v11 }
 0x763   :  { %975 = vst [vmem:[#allocation4 + $0x8] sm:$0xff] %v973_v12 }
 0x764   :  { %1135 = shalt.err (!%p1132_p12)
}
 0x765   :  { %s1136_s21 = scalar_lea.hbm %s1390_s10, 256 }
 0x766   :  { %p1137_p13 = scmp.ne.s32.totalorder %s1390_s10, %s1136_s21  ;;  %p1140_p0 = scmp.lt.u32.totalorder %s1136_s21, %s1390_s10 }
 0x768   :  { %p1142_p1 = pnand %p1140_p0, %p1137_p13 }
 0x76a   :  { %1145 = shalt.err (!%p1142_p1)
}
 0x76b   :  { %995 = dma.vmem_to_hbm [thread:$0]  %s993_s19, 256, %s1390_s10, [#allocation5]  }
 0x76c   :  { %1146 = dma.done.wait [#allocation3], 128  }
 0x76d   :  { %1147 = vsyncadd [#allocation3], 4294967168 }
 0x76e   :  { %1148 = dma.done.wait [#allocation5], 256  }
 0x76f   :  { %1149 = vsyncadd [#allocation5], 4294967040 }
 0x770   :  { %1002 = vsyncpa [#allocation3], 1 }
 0x771   :  { %1003 = vsyncpa [#allocation5], 1 }

</bundles_post_ra>
